<compile_context>
chip_gen: v6e
topology: v6e:2x2x1
jax: 0.10.0
libtpu: 0.0.40
codegen_flags: <defaults>
</compile_context>

<pallas_src>
import math
from functools import partial

import jax
import jax.numpy as jnp
from jax.experimental import pallas as pl
from jax.experimental.pallas import tpu as pltpu

_MASK_VALUE = -1e30  # large finite negative (avoids -inf arithmetic)


# ----------------------------- small utilities -----------------------------

def _round_up(x, m):
    return (x + m - 1) // m * m


def _pick_tile(n, candidates=(512, 256, 128, 64, 32, 16, 8)):
    for c in candidates:
        if n % c == 0:
            return c
    return n


def _pad_to(x, shape):
    pads = [(0, s - d) for d, s in zip(x.shape, shape)]
    if all(p == (0, 0) for p in pads):
        return x
    return jnp.pad(x, pads)


def _cparams(sem):
    return pltpu.CompilerParams(
        dimension_semantics=sem,
        vmem_limit_bytes=48 * 1024 * 1024)


def _layer_norm_padded(x_f32, gamma, beta, n_real, eps=1e-5):
    """LayerNorm over a lane-padded last axis.

    Padded lanes of `x_f32` are zero, so sums over the padded axis equal sums
    over the real `n_real` features; gamma/beta are zero-padded so the padded
    lanes stay exactly zero in the output.
    """
    s1 = jnp.sum(x_f32, axis=-1, keepdims=True)
    s2 = jnp.sum(x_f32 * x_f32, axis=-1, keepdims=True)
    mu = s1 * (1.0 / n_real)
    var = s2 * (1.0 / n_real) - mu * mu
    return (x_f32 - mu) * jax.lax.rsqrt(var + eps) * gamma + beta


def _new_gelu(x):
    c = math.sqrt(2.0 / math.pi)
    return 0.5 * x * (1.0 + jnp.tanh(c * (x + 0.044715 * x * x * x)))


# ----------------------------- Pallas kernels -----------------------------

def ln_qkv_kernel(x_ref, g_ref, b_ref, w_ref, bias_ref, o_ref, *, n_real):
    """x tile -> LayerNorm(x) @ W_qkv + b  (row-tiled)."""
    x = x_ref[...].astype(jnp.float32)
    h = _layer_norm_padded(x, g_ref[...], b_ref[...], n_real)
    qkv = jnp.dot(h.astype(w_ref.dtype), w_ref[...],
                  preferred_element_type=jnp.float32) + bias_ref[...]
    o_ref[...] = qkv.astype(o_ref.dtype)


def flash_attn_kernel(q_ref, k_ref, v_ref, o_ref, m_sc, l_sc, acc_sc,
                      *, scale, tq, tk):
    """Causal flash attention; grid = (B*H, q_tiles, kv_tiles)."""
    qi = pl.program_id(1)
    ki = pl.program_id(2)
    q_start = qi * tq
    k_start = ki * tk

    @pl.when(ki == 0)
    def _():
        m_sc[...] = jnp.full(m_sc.shape, _MASK_VALUE, m_sc.dtype)
        l_sc[...] = jnp.zeros(l_sc.shape, l_sc.dtype)
        acc_sc[...] = jnp.zeros(acc_sc.shape, acc_sc.dtype)

    # Skip KV tiles that lie entirely above the causal diagonal.
    @pl.when(k_start <= q_start + (tq - 1))
    def _():
        q = q_ref[...]                                      # (1, tq, hd) bf16
        k = k_ref[...]
        v = v_ref[...]
        s = jnp.einsum('bqd,bkd->bqk', q, k,
                       preferred_element_type=jnp.float32) * scale
        row = q_start + jax.lax.broadcasted_iota(jnp.int32, (1, tq, tk), 1)
        col = k_start + jax.lax.broadcasted_iota(jnp.int32, (1, tq, tk), 2)
        s = jnp.where(row >= col, s, _MASK_VALUE)
        m_prev = m_sc[...]
        m_new = jnp.maximum(m_prev, jnp.max(s, axis=-1, keepdims=True))
        alpha = jnp.exp(m_prev - m_new)
        p = jnp.exp(s - m_new)
        l_sc[...] = alpha * l_sc[...] + jnp.sum(p, axis=-1, keepdims=True)
        acc_sc[...] = alpha * acc_sc[...] + jnp.einsum(
            'bqk,bkd->bqd', p.astype(v.dtype), v,
            preferred_element_type=jnp.float32)
        m_sc[...] = m_new

    @pl.when(ki == pl.num_programs(2) - 1)
    def _():
        inv_l = pl.reciprocal(l_sc[...], approx=True)
        o_ref[...] = (acc_sc[...] * inv_l).astype(o_ref.dtype)


def post_attn_kernel(x_ref, y_ref, wpr_ref, bpr_ref, g2_ref, b2_ref,
                     wfc_ref, bfc_ref, wp2_ref, bp2_ref, o_ref, *, n_real):
    """x + proj(attn_out)  ->  + MLP(LN2(.))   (row-tiled, fused epilogues)."""
    x = x_ref[...].astype(jnp.float32)
    x1 = x + jnp.dot(y_ref[...], wpr_ref[...],
                     preferred_element_type=jnp.float32) + bpr_ref[...]
    h = _layer_norm_padded(x1, g2_ref[...], b2_ref[...], n_real)
    hid = jnp.dot(h.astype(wfc_ref.dtype), wfc_ref[...],
                  preferred_element_type=jnp.float32) + bfc_ref[...]
    hid = _new_gelu(hid)
    out = x1 + jnp.dot(hid.astype(wp2_ref.dtype), wp2_ref[...],
                       preferred_element_type=jnp.float32) + bp2_ref[...]
    o_ref[...] = out.astype(o_ref.dtype)


def head_kernel(x_ref, g_ref, b_ref, w_ref, o_ref, *, n_real):
    """ln_f + lm_head; grid = (row_tiles, class_tiles)."""
    x = x_ref[...].astype(jnp.float32)
    h = _layer_norm_padded(x, g_ref[...], b_ref[...], n_real)
    o_ref[...] = jnp.dot(h.astype(w_ref.dtype), w_ref[...],
                         preferred_element_type=jnp.float32)


# ----------------------------- pallas_call wrappers -----------------------------

def ln_qkv_call(x_pad, gamma, beta, w, bias, *, n_real):
    Rp, Ep = x_pad.shape
    Np = w.shape[1]
    tr = _pick_tile(Rp)
    return pl.pallas_call(
        partial(ln_qkv_kernel, n_real=n_real),
        out_shape=jax.ShapeDtypeStruct((Rp, Np), x_pad.dtype),
        grid=(Rp // tr,),
        in_specs=[
            pl.BlockSpec((tr, Ep), lambda i: (i, 0)),
            pl.BlockSpec((1, Ep), lambda i: (0, 0)),
            pl.BlockSpec((1, Ep), lambda i: (0, 0)),
            pl.BlockSpec((Ep, Np), lambda i: (0, 0)),   # weights stay resident
            pl.BlockSpec((1, Np), lambda i: (0, 0)),
        ],
        out_specs=pl.BlockSpec((tr, Np), lambda i: (i, 0)),
        compiler_params=_cparams(("parallel",)),
    )(x_pad, gamma, beta, w, bias)


def flash_attention_call(q, k, v, *, tq, tk):
    BH, T, hd = q.shape
    scale = 1.0 / math.sqrt(hd)
    return pl.pallas_call(
        partial(flash_attn_kernel, scale=scale, tq=tq, tk=tk),
        out_shape=jax.ShapeDtypeStruct((BH, T, hd), q.dtype),
        grid=(BH, T // tq, T // tk),
        in_specs=[
            pl.BlockSpec((1, tq, hd), lambda b, i, j: (b, i, 0)),
            pl.BlockSpec((1, tk, hd), lambda b, i, j: (b, j, 0)),
            pl.BlockSpec((1, tk, hd), lambda b, i, j: (b, j, 0)),
        ],
        out_specs=pl.BlockSpec((1, tq, hd), lambda b, i, j: (b, i, 0)),
        scratch_shapes=[
            pltpu.VMEM((1, tq, 1), jnp.float32),   # running max m
            pltpu.VMEM((1, tq, 1), jnp.float32),   # running sum l
            pltpu.VMEM((1, tq, hd), jnp.float32),  # accumulator
        ],
        compiler_params=_cparams(("parallel", "parallel", "arbitrary")),
    )(q, k, v)


def post_attn_call(x_pad, y_pad, wpr, bpr, g2, b2, wfc, bfc, wp2, bp2, *, n_real):
    Rp, Ep = x_pad.shape
    Hp = wfc.shape[1]
    tr = _pick_tile(Rp)
    return pl.pallas_call(
        partial(post_attn_kernel, n_real=n_real),
        out_shape=jax.ShapeDtypeStruct((Rp, Ep), x_pad.dtype),
        grid=(Rp // tr,),
        in_specs=[
            pl.BlockSpec((tr, Ep), lambda i: (i, 0)),
            pl.BlockSpec((tr, Ep), lambda i: (i, 0)),
            pl.BlockSpec((Ep, Ep), lambda i: (0, 0)),
            pl.BlockSpec((1, Ep), lambda i: (0, 0)),
            pl.BlockSpec((1, Ep), lambda i: (0, 0)),
            pl.BlockSpec((1, Ep), lambda i: (0, 0)),
            pl.BlockSpec((Ep, Hp), lambda i: (0, 0)),
            pl.BlockSpec((1, Hp), lambda i: (0, 0)),
            pl.BlockSpec((Hp, Ep), lambda i: (0, 0)),
            pl.BlockSpec((1, Ep), lambda i: (0, 0)),
        ],
        out_specs=pl.BlockSpec((tr, Ep), lambda i: (i, 0)),
        compiler_params=_cparams(("parallel",)),
    )(x_pad, y_pad, wpr, bpr, g2, b2, wfc, bfc, wp2, bp2)


def head_call(x_pad, gamma, beta, w_lm, *, n_real):
    Rp, Ep = x_pad.shape
    Cp = w_lm.shape[1]
    tr = _pick_tile(Rp)
    tc = _pick_tile(Cp, candidates=(512, 256, 128))
    return pl.pallas_call(
        partial(head_kernel, n_real=n_real),
        out_shape=jax.ShapeDtypeStruct((Rp, Cp), jnp.float32),
        grid=(Rp // tr, Cp // tc),
        in_specs=[
            pl.BlockSpec((tr, Ep), lambda i, j: (i, 0)),
            pl.BlockSpec((1, Ep), lambda i, j: (0, 0)),
            pl.BlockSpec((1, Ep), lambda i, j: (0, 0)),
            pl.BlockSpec((Ep, tc), lambda i, j: (0, j)),
        ],
        out_specs=pl.BlockSpec((tr, tc), lambda i, j: (i, j)),
        compiler_params=_cparams(("parallel", "parallel")),
    )(x_pad, gamma, beta, w_lm)


# ----------------------------- parameters (glue) -----------------------------

def init_params(key, *, n_features, block_size, n_embd, n_layer, n_classes):
    """Model parameters in f32, nn.Linear weights pre-transposed to (in, out)."""
    n_keys = 3 + 4 * n_layer
    keys = iter(jax.random.split(key, n_keys))

    def normal(shape, std):
        return jax.random.normal(next(keys), shape, jnp.float32) * std

    cp_std = 0.02 / math.sqrt(2 * n_layer)
    params = {
        'wte': normal((n_features, n_embd), 0.02),
        'wpe': normal((block_size, n_embd), 0.02),
        'lm_head': normal((n_embd, n_classes), 0.02),     # (in, out), no bias
        'ln_f_w': jnp.ones((1, n_embd), jnp.float32),
        'ln_f_b': jnp.zeros((1, n_embd), jnp.float32),
        'blocks': [],
    }
    for _ in range(n_layer):
        params['blocks'].append(dict(
            ln1_w=jnp.ones((1, n_embd), jnp.float32),
            ln1_b=jnp.zeros((1, n_embd), jnp.float32),
            w_qkv=normal((n_embd, 3 * n_embd), 0.02),
            b_qkv=jnp.zeros((1, 3 * n_embd), jnp.float32),
            w_proj=normal((n_embd, n_embd), cp_std),      # attn c_proj special init
            b_proj=jnp.zeros((1, n_embd), jnp.float32),
            ln2_w=jnp.ones((1, n_embd), jnp.float32),
            ln2_b=jnp.zeros((1, n_embd), jnp.float32),
            w_fc=normal((n_embd, 4 * n_embd), 0.02),
            b_fc=jnp.zeros((1, 4 * n_embd), jnp.float32),
            w_proj2=normal((4 * n_embd, n_embd), cp_std), # mlp c_proj special init
            b_proj2=jnp.zeros((1, n_embd), jnp.float32),
        ))
    return params


def prepare_pallas_params(params):
    """Pad feature dims to multiples of 128, cast matmul weights to bf16."""
    E = params['wte'].shape[1]
    Ep = _round_up(E, 128)
    C = params['lm_head'].shape[1]
    Cp = _round_up(C, 128)

    def pad_w(w, out_pad):                    # zero-pad (in, out) then bf16
        return _pad_to(w, (Ep, out_pad)).astype(jnp.bfloat16)

    def pad_vec(v, out_pad):                  # gamma/beta/bias zero-padded, f32
        return _pad_to(v, (1, out_pad)).astype(jnp.float32)

    def pad_qkv_w(w):                         # keep q|k|v chunk boundaries at Ep
        q, k, v = jnp.split(w, 3, axis=1)
        return jnp.concatenate(
            [_pad_to(q, (Ep, Ep)), _pad_to(k, (Ep, Ep)), _pad_to(v, (Ep, Ep))],
            axis=1).astype(jnp.bfloat16)

    def pad_qkv_b(b):
        q, k, v = jnp.split(b, 3, axis=1)
        return jnp.concatenate(
            [_pad_to(q, (1, Ep)), _pad_to(k, (1, Ep)), _pad_to(v, (1, Ep))],
            axis=1).astype(jnp.float32)

    pp = {
        'E': E, 'Ep': Ep, 'C': C, 'Cp': Cp,
        'wte': params['wte'],
        'wpe': params['wpe'],
        'ln_f_w': pad_vec(params['ln_f_w'], Ep),
        'ln_f_b': pad_vec(params['ln_f_b'], Ep),
        'lm_head': pad_w(params['lm_head'], Cp),
        'blocks': [],
    }
    for blk in params['blocks']:
        pp['blocks'].append(dict(
            ln1_w=pad_vec(blk['ln1_w'], Ep), ln1_b=pad_vec(blk['ln1_b'], Ep),
            w_qkv=pad_qkv_w(blk['w_qkv']), b_qkv=pad_qkv_b(blk['b_qkv']),
            w_proj=pad_w(blk['w_proj'], Ep), b_proj=pad_vec(blk['b_proj'], Ep),
            ln2_w=pad_vec(blk['ln2_w'], Ep), ln2_b=pad_vec(blk['ln2_b'], Ep),
            w_fc=pad_w(blk['w_fc'], 4 * Ep), b_fc=pad_vec(blk['b_fc'], 4 * Ep),
            w_proj2=_pad_to(blk['w_proj2'], (4 * Ep, Ep)).astype(jnp.bfloat16),
            b_proj2=pad_vec(blk['b_proj2'], Ep),
        ))
    return pp


# ----------------------------- forward (glue) -----------------------------

def forward_pallas(pp, idx, *, n_head):
    B, T = idx.shape
    E, Ep = pp['E'], pp['Ep']
    C = pp['C']
    hd = E // n_head
    R = B * T
    Rp = _round_up(R, 8)

    tok = jnp.take(pp['wte'], idx, axis=0)                 # (B, T, E)
    pos = pp['wpe'][:T][None]                              # (1, T, E)
    x = (tok + pos).reshape(R, E)                          # drop(p=0) = identity
    x_pad = _pad_to(x, (Rp, Ep)).astype(jnp.bfloat16)      # lane/row padded stream

    t_seq = _pick_tile(T, candidates=(256, 128, 64, 32, 16, 8))

    def split_heads(a):                                    # (R, E) -> (B*H, T, hd)
        return (a.reshape(B, T, n_head, hd)
                 .transpose(0, 2, 1, 3)
                 .reshape(B * n_head, T, hd))

    for blk in pp['blocks']:
        qkv = ln_qkv_call(x_pad, blk['ln1_w'], blk['ln1_b'],
                          blk['w_qkv'], blk['b_qkv'], n_real=E)[:R]
        q = split_heads(qkv[:, 0:E])
        k = split_heads(qkv[:, Ep:Ep + E])
        v = split_heads(qkv[:, 2 * Ep:2 * Ep + E])

        y = flash_attention_call(q, k, v, tq=t_seq, tk=t_seq)   # (B*H, T, hd)
        y = (y.reshape(B, n_head, T, hd)
               .transpose(0, 2, 1, 3)
               .reshape(R, E))
        y_pad = _pad_to(y, (Rp, Ep))

        x_pad = post_attn_call(x_pad, y_pad,
                               blk['w_proj'], blk['b_proj'],
                               blk['ln2_w'], blk['ln2_b'],
                               blk['w_fc'], blk['b_fc'],
                               blk['w_proj2'], blk['b_proj2'],
                               n_real=E)

    logits = head_call(x_pad, pp['ln_f_w'], pp['ln_f_b'], pp['lm_head'],
                       n_real=E)
    return logits[:R, :C].reshape(B, T, C)


# ----------------------------- pure-JAX reference -----------------------------

def _layer_norm_ref(x, w, b, eps=1e-5):
    mu = jnp.mean(x, axis=-1, keepdims=True)
    xc = x - mu
    var = jnp.mean(xc * xc, axis=-1, keepdims=True)
    return xc * jax.lax.rsqrt(var + eps) * w + b


def _ref_block(x, blk, n_head):
    B, T, E = x.shape
    hd = E // n_head
    h = _layer_norm_ref(x, blk['ln1_w'], blk['ln1_b'])
    qkv = h @ blk['w_qkv'] + blk['b_qkv']
    q, k, v = jnp.split(qkv, 3, axis=-1)
    q = q.reshape(B, T, n_head, hd).transpose(0, 2, 1, 3)
    k = k.reshape(B, T, n_head, hd).transpose(0, 2, 1, 3)
    v = v.reshape(B, T, n_head, hd).transpose(0, 2, 1, 3)
    att = jnp.einsum('bhtd,bhsd->bhts', q, k) / math.sqrt(hd)
    mask = jnp.tril(jnp.ones((T, T), bool))
    att = jnp.where(mask[None, None], att, -jnp.inf)
    att = jax.nn.softmax(att, axis=-1)
    y = jnp.einsum('bhts,bhsd->bhtd', att, v)
    y = y.transpose(0, 2, 1, 3).reshape(B, T, E)
    x = x + (y @ blk['w_proj'] + blk['b_proj'])
    m = _layer_norm_ref(x, blk['ln2_w'], blk['ln2_b'])
    m = _new_gelu(m @ blk['w_fc'] + blk['b_fc'])
    return x + (m @ blk['w_proj2'] + blk['b_proj2'])


def forward_ref(params, idx, *, n_head):
    B, T = idx.shape
    x = jnp.take(params['wte'], idx, axis=0) + params['wpe'][:T][None]
    for blk in params['blocks']:
        x = _ref_block(x, blk, n_head)
    x = _layer_norm_ref(x, params['ln_f_w'], params['ln_f_b'])
    return x @ params['lm_head']


# ----------------------------- main -----------------------------

if __name__ == "__main__":
    B, T = 2, 8
    n_embd, n_head, n_layer = 32, 4, 2
    n_features, n_classes, block_size = 16, 10, 8

    key = jax.random.PRNGKey(0)
    pkey, ikey = jax.random.split(key)
    params = init_params(pkey, n_features=n_features, block_size=block_size,
                         n_embd=n_embd, n_layer=n_layer, n_classes=n_classes)
    idx = jax.random.randint(ikey, (B, T), 0, n_features, dtype=jnp.int32)

    pparams = prepare_pallas_params(params)
    logits = forward_pallas(pparams, idx, n_head=n_head)
    logits = jax.block_until_ready(logits)

    assert logits.shape == (B, T, n_classes), logits.shape
    ref = forward_ref(params, idx, n_head=n_head)
    # bf16 MXU inputs (f32 accumulation) vs f32 reference -> loose tolerance.
    assert jnp.allclose(logits, ref, atol=2e-2, rtol=2e-2), \
        float(jnp.max(jnp.abs(logits - ref)))

    print("KERNEL_OK")
</pallas_src>

<mosaic_0001>
module attributes {stable_mosaic.version = 11 : i64} {
  func.func @ln_qkv_kernel(%arg0: i32, %arg1: memref<16x128xbf16, #tpu.memory_space<vmem>>, %arg2: memref<1x128xf32, #tpu.memory_space<vmem>>, %arg3: memref<1x128xf32, #tpu.memory_space<vmem>>, %arg4: memref<128x384xbf16, #tpu.memory_space<vmem>>, %arg5: memref<1x384xf32, #tpu.memory_space<vmem>>, %arg6: memref<16x384xbf16, #tpu.memory_space<vmem>>) attributes {dimension_semantics = [#tpu.dimension_semantics<parallel>], iteration_bounds = array<i64: 1>, scalar_prefetch = 0 : i64, scratch_operands = 0 : i64, tpu.core_type = #tpu.core_type<tc>, window_params = [{transform_indices = @transform_0, window_bounds = array<i64: 16, 128>}, {pipeline_mode = #tpu.pipeline_mode<synchronous>, transform_indices = @transform_1, window_bounds = array<i64: 1, 128>}, {pipeline_mode = #tpu.pipeline_mode<synchronous>, transform_indices = @transform_2, window_bounds = array<i64: 1, 128>}, {pipeline_mode = #tpu.pipeline_mode<synchronous>, transform_indices = @transform_3, window_bounds = array<i64: 128, 384>}, {pipeline_mode = #tpu.pipeline_mode<synchronous>, transform_indices = @transform_4, window_bounds = array<i64: 1, 384>}, {transform_indices = @transform_5, window_bounds = array<i64: 16, 384>}]} {
    %c0 = arith.constant 0 : index
    %c0_0 = arith.constant 0 : index
    %0 = vector.load %arg1[%c0, %c0_0] : memref<16x128xbf16, #tpu.memory_space<vmem>>, vector<16x128xbf16>
    %1 = arith.extf %0 : vector<16x128xbf16> to vector<16x128xf32>
    %c0_1 = arith.constant 0 : index
    %c0_2 = arith.constant 0 : index
    %2 = vector.load %arg2[%c0_1, %c0_2] : memref<1x128xf32, #tpu.memory_space<vmem>>, vector<1x128xf32>
    %c0_3 = arith.constant 0 : index
    %c0_4 = arith.constant 0 : index
    %3 = vector.load %arg3[%c0_3, %c0_4] : memref<1x128xf32, #tpu.memory_space<vmem>>, vector<1x128xf32>
    %cst = arith.constant dense<0.000000e+00> : vector<16xf32>
    %4 = vector.multi_reduction <add>, %1, %cst [1] : vector<16x128xf32> to vector<16xf32>
    %5 = vector.shape_cast %4 : vector<16xf32> to vector<16x1xf32>
    %6 = arith.mulf %1, %1 : vector<16x128xf32>
    %cst_5 = arith.constant dense<0.000000e+00> : vector<16xf32>
    %7 = vector.multi_reduction <add>, %6, %cst_5 [1] : vector<16x128xf32> to vector<16xf32>
    %8 = vector.shape_cast %7 : vector<16xf32> to vector<16x1xf32>
    %cst_6 = arith.constant 3.125000e-02 : f32
    %9 = vector.broadcast %cst_6 : f32 to vector<16x1xf32>
    %10 = arith.mulf %5, %9 : vector<16x1xf32>
    %cst_7 = arith.constant 3.125000e-02 : f32
    %11 = vector.broadcast %cst_7 : f32 to vector<16x1xf32>
    %12 = arith.mulf %8, %11 : vector<16x1xf32>
    %13 = arith.mulf %10, %10 : vector<16x1xf32>
    %14 = arith.subf %12, %13 : vector<16x1xf32>
    %15 = vector.broadcast %10 : vector<16x1xf32> to vector<16x128xf32>
    %16 = arith.subf %1, %15 : vector<16x128xf32>
    %cst_8 = arith.constant 9.99999974E-6 : f32
    %17 = vector.broadcast %cst_8 : f32 to vector<16x1xf32>
    %18 = arith.addf %14, %17 : vector<16x1xf32>
    %19 = math.rsqrt %18 : vector<16x1xf32>
    %20 = vector.broadcast %19 : vector<16x1xf32> to vector<16x128xf32>
    %21 = arith.mulf %16, %20 : vector<16x128xf32>
    %22 = vector.broadcast %2 : vector<1x128xf32> to vector<16x128xf32>
    %23 = arith.mulf %21, %22 : vector<16x128xf32>
    %24 = vector.broadcast %3 : vector<1x128xf32> to vector<16x128xf32>
    %25 = arith.addf %23, %24 : vector<16x128xf32>
    %26 = arith.truncf %25 : vector<16x128xf32> to vector<16x128xbf16>
    %c0_9 = arith.constant 0 : index
    %c0_10 = arith.constant 0 : index
    %27 = vector.load %arg4[%c0_9, %c0_10] : memref<128x384xbf16, #tpu.memory_space<vmem>>, vector<128x384xbf16>
    %cst_11 = arith.constant dense<0.000000e+00> : vector<16x384xf32>
    %28 = tpu.matmul %26, %27, %cst_11 {dimension_numbers = #tpu.dot_dimension_numbers<[1], [0], [0], [1], [0, 0, 1, 1], [], []>} : vector<16x128xbf16>, vector<128x384xbf16>, vector<16x384xf32> -> vector<16x384xf32>
    %c0_12 = arith.constant 0 : index
    %c0_13 = arith.constant 0 : index
    %29 = vector.load %arg5[%c0_12, %c0_13] : memref<1x384xf32, #tpu.memory_space<vmem>>, vector<1x384xf32>
    %30 = vector.broadcast %29 : vector<1x384xf32> to vector<16x384xf32>
    %31 = arith.addf %28, %30 : vector<16x384xf32>
    %32 = arith.truncf %31 : vector<16x384xf32> to vector<16x384xbf16>
    %c0_14 = arith.constant 0 : index
    %c0_15 = arith.constant 0 : index
    %33 = vector.load %arg6[%c0_14, %c0_15] : memref<16x384xbf16, #tpu.memory_space<vmem>>, vector<16x384xbf16>
    tpu.vector_store %arg6[%c0_14, %c0_15], %32 {strides = array<i32>} : memref<16x384xbf16, #tpu.memory_space<vmem>>, vector<16x384xbf16>,
    return
  }
  func.func @transform_0(%arg0: i32) -> (i32, i32) {
    %c0_i32 = arith.constant 0 : i32
    %c0_i32_0 = arith.constant 0 : i32
    return %arg0, %c0_i32 : i32, i32
  }
  func.func @transform_1(%arg0: i32) -> (i32, i32) {
    %c0_i32 = arith.constant 0 : i32
    %c0_i32_0 = arith.constant 0 : i32
    %c0_i32_1 = arith.constant 0 : i32
    return %c0_i32, %c0_i32_0 : i32, i32
  }
  func.func @transform_2(%arg0: i32) -> (i32, i32) {
    %c0_i32 = arith.constant 0 : i32
    %c0_i32_0 = arith.constant 0 : i32
    %c0_i32_1 = arith.constant 0 : i32
    return %c0_i32, %c0_i32_0 : i32, i32
  }
  func.func @transform_3(%arg0: i32) -> (i32, i32) {
    %c0_i32 = arith.constant 0 : i32
    %c0_i32_0 = arith.constant 0 : i32
    %c0_i32_1 = arith.constant 0 : i32
    return %c0_i32, %c0_i32_0 : i32, i32
  }
  func.func @transform_4(%arg0: i32) -> (i32, i32) {
    %c0_i32 = arith.constant 0 : i32
    %c0_i32_0 = arith.constant 0 : i32
    %c0_i32_1 = arith.constant 0 : i32
    return %c0_i32, %c0_i32_0 : i32, i32
  }
  func.func @transform_5(%arg0: i32) -> (i32, i32) {
    %c0_i32 = arith.constant 0 : i32
    %c0_i32_0 = arith.constant 0 : i32
    return %arg0, %c0_i32 : i32, i32
  }
}

</mosaic_0001>

<bundles_post_ra>
// kernel: tpu_custom_call.1
= control target key start
LH: loop header
LB: loop body
LE: loop exit
PB: predicated region body
PF: predicated region fallthrough
CT: control target
= control target key end

     0   :  { %10 = vsyncpa [#allocation3], 0  ;;  %s657_s0 = inlined_call_operand.hbm [shape: bf16[16,128], index: 0, kind: input, shape index: {}]   ;;  %s658_s1 = inlined_call_operand.vmem [shape: f32[1,128], index: 1, kind: input, shape index: {}]   ;;  %s659_s2 = inlined_call_operand.vmem [shape: f32[1,128], index: 2, kind: input, shape index: {}]   ;;  %s660_s3 = inlined_call_operand.hbm [shape: bf16[128,384], index: 3, kind: input, shape index: {}]   ;;  %s661_s4 = inlined_call_operand.vmem [shape: f32[1,384], index: 4, kind: input, shape index: {}]   ;;  %s662_s5 = inlined_call_operand.hbm [shape: bf16[16,384], index: 5, kind: output, shape index: {}]  }
   0x1   :  { %11 = vsyncpa [#allocation6], 0 }
   0x2   :  { %12 = vsyncpa [#allocation4], 0  ;;  %s581_s18 = smov [#allocation2]  }
   0x3   :  { %s18_s19 = sshll.u32 %s581_s18, 4  ;;  %s19_s19 = int_to_ptr.vmem [resolvable:$true] %s18_s19 }
   0x4   :  { %s523_s20 = scalar_lea.vmem %s19_s19, 128  ;;  %p528_p1 = scmp.lt.s32.totalorder %s19_s19, %s19_s19 }
   0x5   :  { %p524_p0 = scmp.ne.s32.totalorder %s19_s19, %s523_s20  ;;  %p529_p2 = scmp.lt.s32.totalorder %s523_s20, %s523_s20 }
   0x7   :  { %p530_p3 = por %p529_p2, %p528_p1 }
   0x9   :  { %p531_p4 = pnand %p530_p3, %p524_p0 }
   0xb   :  { %534 = shalt.err (!%p531_p4)
}
   0xc   :  { %s582_s21 = smov 64   ;;  %s583_s22 = smov 4  }
   0xd   :  { %24 = dma.hbm_to_vmem [thread:$0]  %s657_s0, 128, %s19_s19, [#allocation3], %s582_s21, %s582_s21, %s583_s22  }
   0xe   :  { %s584_s25 = smov [#allocation5]  }
   0xf   :  { %s34_s26 = sshll.u32 %s584_s25, 4  ;;  %s35_s26 = int_to_ptr.vmem [resolvable:$true] %s34_s26 }
  0x10   :  { %s543_s27 = scalar_lea.vmem %s35_s26, 3072  ;;  %p548_p6 = scmp.lt.s32.totalorder %s35_s26, %s35_s26 }
  0x11   :  { %p544_p5 = scmp.ne.s32.totalorder %s35_s26, %s543_s27  ;;  %p549_p7 = scmp.lt.s32.totalorder %s543_s27, %s543_s27 }
  0x13   :  { %p550_p8 = por %p549_p7, %p548_p6 }
  0x15   :  { %p551_p9 = pnand %p550_p8, %p544_p5 }
  0x17   :  { %554 = shalt.err (!%p551_p9)
}
  0x18   :  { %s585_s28 = smov 192   ;;  %s586_s29 = smov 12  }
  0x19   :  { %40 = dma.hbm_to_vmem [thread:$0]  %s660_s3, 3072, %s35_s26, [#allocation6], %s585_s28, %s585_s28, %s586_s29  }
  0x1a   :  { %575 = dma.done.wait [#allocation3], 128  }
  0x1b   :  { %576 = vsyncadd [#allocation3], 4294967168 }
  0x1c   :  { %577 = dma.done.wait [#allocation6], 3072  }
  0x1d   :  { %578 = vsyncadd [#allocation6], 4294964224  ;;  %v437_v0 = vld [vmem:[#allocation2] sm:$0xff]   ;;  %v481_v6 = vld [vmem:[#allocation5 + $0xa8] ss:$12 sps:$4 sm:$0xff]   ;;  %v587_v8 = vmov 0.0   ;;  %v133_v58 = vlaneseq }
  0x1e   :  { %v630_v1 = vunpack.c.l.bf16 %v437_v0  ;;  %v632_v2 = vunpack.c.h.bf16 %v437_v0  ;;  %v479_v5 = vld [vmem:[#allocation5 + $0xac] ss:$12 sps:$4 sm:$0xff]   ;;  %v482_v7 = vld [vmem:[#allocation5 + $0xb0] ss:$12 sps:$4 sm:$0xff]   ;;  %449 = vmatprep.subr.bf16.mxu1 %v587_v8  ;;  %v483_v9 = vld [vmem:[#allocation5 + $0x94] ss:$12 sps:$4 sm:$0xff]  }
  0x1f   :  { %276 = vmatprep.subr.bf16.mxu0 %v479_v5  ;;  %450 = vmatpush3.bf16.msra.mxu1 %v482_v7  ;;  %v485_v10 = vld [vmem:[#allocation5 + $0x90] ss:$12 sps:$4 sm:$0xff]   ;;  %v486_v11 = vld [vmem:[#allocation5 + $0x98] ss:$12 sps:$4 sm:$0xff]   ;;  %v490_v14 = vld [vmem:[#allocation5 + $0x80] ss:$12 sps:$4 sm:$0xff]  }
  0x20   :  { %56 = vadd.xlane.f32.xlu0 %v630_v1  ;;  %v60_v3 = vmul.f32 %v630_v1, %v630_v1  ;;  %v61_v4 = vmul.f32 %v632_v2, %v632_v2  ;;  %277 = vmatpush1.bf16.msra.mxu0 %v481_v6  ;;  %v487_v12 = vld [vmem:[#allocation5 + $0x7c] ss:$12 sps:$4 sm:$0xff]   ;;  %v489_v13 = vld [vmem:[#allocation5 + $0x78] ss:$12 sps:$4 sm:$0xff]   ;;  %v493_v16 = vld [vmem:[#allocation5 + $0x60] ss:$12 sps:$4 sm:$0xff]  }
  0x21   :  { %451 = vmatprep.subr.bf16.mxu1 %v587_v8  ;;  %278 = vmatprep.subr.bf16.mxu0 %v483_v9  ;;  %v491_v15 = vld [vmem:[#allocation5 + $0x64] ss:$12 sps:$4 sm:$0xff]   ;;  %v494_v17 = vld [vmem:[#allocation5 + $0x68] ss:$12 sps:$4 sm:$0xff]   ;;  %v495_v18 = vld [vmem:[#allocation5 + $0x4c] ss:$12 sps:$4 sm:$0xff]  }
  0x22   :  { %62 = vadd.xlane.f32.xlu1 %v60_v3  ;;  %v497_v19 = vld [vmem:[#allocation5 + $0x48] ss:$12 sps:$4 sm:$0xff]   ;;  %v498_v20 = vld [vmem:[#allocation5 + $0x50] ss:$12 sps:$4 sm:$0xff]   ;;  %v588_v22 = vmov 0   ;;  %vm589_vm0 = vmmov 0  }
  0x23   :  { %452 = vmatpush3.bf16.msra.mxu1 %v486_v11  ;;  %v499_v21 = vld [vmem:[#allocation5 + $0x34] ss:$12 sps:$4 sm:$0xff]   ;;  %308 = vmatprep.mubr.bf16.mxu0 %v588_v22  ;;  %v501_v23 = vld [vmem:[#allocation5 + $0x30] ss:$12 sps:$4 sm:$0xff]   ;;  %v502_v24 = vld [vmem:[#allocation5 + $0x38] ss:$12 sps:$4 sm:$0xff]  }
  0x24   :  { %58 = vadd.xlane.f32.xlu0 %v632_v2  ;;  %279 = vmatpush1.bf16.msra.mxu0 %v485_v10  ;;  %v503_v25 = vld [vmem:[#allocation5 + $0x1c] ss:$12 sps:$4 sm:$0xff]   ;;  %v505_v26 = vld [vmem:[#allocation5 + $0x18] ss:$12 sps:$4 sm:$0xff]   ;;  %v506_v27 = vld [vmem:[#allocation5 + $0x20] ss:$12 sps:$4 sm:$0xff]  }
  0x25   :  { %453 = vmatprep.subr.bf16.mxu1 %v587_v8  ;;  %280 = vmatprep.subr.bf16.mxu0 %v487_v12  ;;  %v507_v28 = vld [vmem:[#allocation5 + $0x4] ss:$12 sps:$4 sm:$0xff]   ;;  %v509_v29 = vld [vmem:[#allocation5] ss:$12 sps:$4 sm:$0xff]   ;;  %v510_v30 = vld [vmem:[#allocation5 + $0x8] ss:$12 sps:$4 sm:$0xff]  }
  0x26   :  { %64 = vadd.xlane.f32.xlu1 %v61_v4  ;;  %465 = vmatprep.mubr.msk.bf16.mxu1 %vm589_vm0, %v587_v8  ;;  %v402_v48 = vld [vmem:[%s658_s1] ss:$0 sm:$0xff]  ;;  %v134_v59 = vshrl.u32 %v133_v58, 7 }
  0x27   :  { %454 = vmatpush3.bf16.msra.mxu1 %v490_v14  ;;  %v403_v53 = vld [vmem:[%s659_s2] ss:$0 sm:$0xff]  ;;  %s590_s2 = smov [#allocation7]  }
  0x28   :  { %281 = vmatpush1.bf16.msra.mxu0 %v489_v13  ;;  %455 = vmatprep.subr.bf16.mxu1 %v587_v8  ;;  %v143_v60 = vsub.s32 2, %v134_v59  ;;  %v131_v61 = vld [vmem:[%s661_s4] sm:$0x7]  ;;  %v135_v62 = vsub.s32 0, %v134_v59  ;;  %v139_v63 = vsub.s32 1, %v134_v59  ;;  %s389_s4 = sshll.u32 %s590_s2, 4  ;;  %s390_s4 = int_to_ptr.vmem [resolvable:$true] %s389_s4 }
  0x29   :  { %282 = vmatprep.subr.bf16.mxu0 %v491_v15  ;;  %s555_s10 = scalar_lea.vmem %s390_s4, 384  ;;  %p560_p11 = scmp.lt.s32.totalorder %s390_s4, %s390_s4 }
  0x2a   :  { %v144_v0 = vrot.slane %v131_v61, %v143_v60  ;;  %p556_p10 = scmp.ne.s32.totalorder %s390_s4, %s555_s10  ;;  %p561_p12 = scmp.lt.s32.totalorder %s555_s10, %s555_s10 }
  0x2b   :  { %456 = vmatpush3.bf16.msra.mxu1 %v494_v17 }
  0x2c   :  { %283 = vmatpush1.bf16.msra.mxu0 %v493_v16  ;;  %457 = vmatprep.subr.bf16.mxu1 %v587_v8  ;;  %p562_p13 = por %p561_p12, %p560_p11 }
  0x2d   :  { %284 = vmatprep.subr.bf16.mxu0 %v495_v18 }
  0x2e   :  { %p563_p0 = pnand %p562_p13, %p556_p10 }
  0x2f   :  { %458 = vmatpush3.bf16.msra.mxu1 %v498_v20 }
  0x30   :  { %285 = vmatpush1.bf16.msra.mxu0 %v497_v19  ;;  %459 = vmatprep.subr.bf16.mxu1 %v587_v8 }
  0x31   :  { %286 = vmatprep.subr.bf16.mxu0 %v499_v21 }
  0x33   :  { %460 = vmatpush3.bf16.msra.mxu1 %v502_v24 }
  0x34   :  { %287 = vmatpush1.bf16.msra.mxu0 %v501_v23  ;;  %461 = vmatprep.subr.bf16.mxu1 %v587_v8 }
  0x35   :  { %288 = vmatprep.subr.bf16.mxu0 %v503_v25 }
  0x37   :  { %462 = vmatpush3.bf16.msra.mxu1 %v506_v27 }
  0x38   :  { %289 = vmatpush1.bf16.msra.mxu0 %v505_v26  ;;  %463 = vmatprep.subr.bf16.mxu1 %v587_v8 }
  0x39   :  { %290 = vmatprep.subr.bf16.mxu0 %v507_v28 }
  0x3b   :  { %464 = vmatpush3.bf16.msra.mxu1 %v510_v30 }
  0x3c   :  { %291 = vmatpush1.bf16.msra.mxu0 %v509_v29 }
  0xa9   :  { %v57_v31 = vpop.xlane.xlu0 %56 }
  0xaa   :  { %v66_v32 = vmul.f32 0.03125, %v57_v31 }
  0xab   :  { %v63_v33 = vpop.xlane.xlu1 %62 }
  0xac   :  { %v70_v34 = vmul.f32 %v66_v32, %v66_v32  ;;  %v68_v35 = vmul.f32 0.03125, %v63_v33  ;;  %v74_v45 = vsub.f32 %v630_v1, %v66_v32  ;;  %v136_v1 = vrot.slane %v131_v61, %v135_v62 }
  0xad   :  { %v59_v36 = vpop.xlane.xlu0 %58 }
  0xae   :  { %v72_v37 = vsub.f32 %v68_v35, %v70_v34  ;;  %v67_v38 = vmul.f32 0.03125, %v59_v36 }
  0xaf   :  { %v65_v39 = vpop.xlane.xlu1 %64 }
  0xb0   :  { %v76_v40 = vadd.f32 1e-05, %v72_v37  ;;  %v71_v41 = vmul.f32 %v67_v38, %v67_v38  ;;  %v69_v42 = vmul.f32 0.03125, %v65_v39  ;;  %v75_v49 = vsub.f32 %v632_v2, %v67_v38 }
  0xb1   :  { %v140_v2 = vrot.slane %v131_v61, %v139_v63 }
  0xb2   :  { %511 = vrsqrt.f32 %v76_v40  ;;  %v73_v43 = vsub.f32 %v69_v42, %v71_v41 }
  0xb4   :  { %v77_v44 = vadd.f32 1e-05, %v73_v43 }
  0xb6   :  { %513 = vrsqrt.f32 %v77_v44 }
  0xbf   :  { %v512_v46 = vpop.eup %511 }
  0xc0   :  { %v80_v47 = vmul.f32 %v512_v46, %v74_v45 }
  0xc2   :  { %v88_v52 = vmul.f32 %v402_v48, %v80_v47 }
  0xc3   :  { %v514_v50 = vpop.eup %513 }
  0xc4   :  { %v81_v51 = vmul.f32 %v514_v50, %v75_v49  ;;  %v96_v55 = vadd.f32 %v403_v53, %v88_v52 }
  0xc6   :  { %v89_v54 = vmul.f32 %v402_v48, %v81_v51 }
  0xc8   :  { %v97_v56 = vadd.f32 %v403_v53, %v89_v54 }
  0xca   :  { %v98_v57 = vpack.c.bf16 %v97_v56, %v96_v55 }
  0xcc   :  { %309 = vmatmul.mubr.bf16.vlgmr.msra.gmra.mxu0 %v98_v57  ;;  %466 = vmatmul.mubr.bf16.vlgmr.msra.gmra.mxu1 %v98_v57 }
 0x18c   :  { %v310_v3 = vpop.f32.mrf.mxu0  ;;  %v353_v4 = vpop.f32.mrf.mxu1 }
 0x18d   :  { %v354_v5 = vadd.f32 %v353_v4, %v144_v0  ;;  %v311_v8 = vadd.f32 %v310_v3, %v136_v1 }
 0x18e   :  { %v312_v6 = vpop.f32.mrf.mxu0  ;;  %v467_v7 = vpop.f32.mrf.mxu1 }
 0x18f   :  { %v433_v9 = vpack.c.bf16 %v354_v5, %v354_v5  ;;  %v313_v10 = vadd.f32 %v312_v6, %v140_v2 }
 0x190   :  { %v314_v11 = vpop.f32.mrf.mxu0  ;;  %v356_v12 = vpop.f32.mrf.mxu1 }
 0x191   :  { %381 = vst [vmem:[#allocation7 + $0x8] sm:$0xf] %v433_v9  ;;  %v432_v13 = vpack.c.bf16 %v313_v10, %v311_v8  ;;  %v357_v14 = vadd.f32 %v356_v12, %v144_v0  ;;  %v315_v17 = vadd.f32 %v314_v11, %v136_v1 }
 0x192   :  { %v316_v15 = vpop.f32.mrf.mxu0  ;;  %v468_v16 = vpop.f32.mrf.mxu1 }
 0x193   :  { %380 = vst [vmem:[#allocation7] sm:$0xff] %v432_v13  ;;  %v435_v18 = vpack.c.bf16 %v357_v14, %v357_v14  ;;  %v317_v19 = vadd.f32 %v316_v15, %v140_v2 }
 0x195   :  { %383 = vst [vmem:[#allocation7 + $0x14] sm:$0xf] %v435_v18  ;;  %v434_v20 = vpack.c.bf16 %v317_v19, %v315_v17 }
 0x197   :  { %382 = vst [vmem:[#allocation7 + $0xc] sm:$0xff] %v434_v20 }
 0x198   :  { %566 = shalt.err (!%p563_p0)
}
 0x199   :  { %395 = dma.vmem_to_hbm [thread:$0]  %s390_s4, 384, %s662_s5, [#allocation4], %s585_s28, %s585_s28, %s586_s29  }
 0x19a   :  { %579 = dma.done.wait [#allocation4], 384  }
 0x19b   :  { %580 = vsyncadd [#allocation4], 4294966912 }
 0x19c   :  { %399 = vsyncpa [#allocation3], 1 }
 0x19d   :  { %400 = vsyncpa [#allocation6], 1 }
 0x19e   :  { %401 = vsyncpa [#allocation4], 1 }

</bundles_post_ra>
